<compile_context>
chip_gen: v7x
topology: tpu7x:2x2x1
jax: 0.10.0
libtpu: 0.0.40
codegen_flags: <defaults>
</compile_context>

<pallas_src>
import numpy as np
import jax
import jax.numpy as jnp
from jax.experimental import pallas as pl
from jax.experimental.pallas import tpu as pltpu


# ----------------------------- Pallas kernel ------------------------------- #

def _fused_gcn_pool_kernel(p_ref, w1f_ref, a_ref, b1_ref, pa_ref, w2_ref,
                           b2_ref, o_ref):
    """Fused patch-emb + GCNConv1 + ReLU + (pool∘GCNConv2) for one batch block.

    Layout (Rb = b_block*H rows on sublanes, d_model on lanes):
      p_ref  : (Rb, L)       raw temporal patches for this batch block
      w1f_ref: (L, D)        W_t @ W1                      (folded conv+GCN1)
      a_ref  : (Rb, Rb)      kron(I_bblk, A_hat)
      b1_ref : (Rb, D)  f32  rowsum(A_hat)*(b_t@W1) + b1   (merged biases)
      pa_ref : (Gb, Rb)      kron(I_bblk, pool @ A_hat)    (pool folded in)
      w2_ref : (D, Dp)       W2 zero-padded to 128 lanes
      b2_ref : (1, Dp)  f32  b2 zero-padded to 128 lanes
      o_ref  : (Gb, Dp) f32  lane-dense output slab
    """
    cdt = p_ref.dtype
    # folded Conv1d patch embedding + (X @ W1) of GCN layer 1
    y = jnp.dot(p_ref[...], w1f_ref[...], preferred_element_type=jnp.float32)
    # layer-1 aggregation (block-diag A_hat) + merged bias + ReLU
    h = jnp.dot(a_ref[...], y.astype(cdt), preferred_element_type=jnp.float32)
    h = jnp.maximum(h + b1_ref[...], 0.0)
    # layer-2 aggregation fused with group-mean pooling (PA = pool @ A_hat)
    hp = jnp.dot(pa_ref[...], h.astype(cdt), preferred_element_type=jnp.float32)
    # layer-2 weight + bias (mean-pool rows sum to 1 => b2 passes through)
    o = jnp.dot(hp.astype(cdt), w2_ref[...], preferred_element_type=jnp.float32)
    o_ref[...] = o + b2_ref[...]


def fused_gcn_pool(patches, w1f, a_blk, bias1_blk, pa_blk, w2p, b2p,
                   *, b_block, H, G):
    BH, L = patches.shape
    B = BH // H
    D = w1f.shape[1]
    Dp = w2p.shape[1]
    Rb = b_block * H
    Gb = b_block * G
    nblk = B // b_block

    itm = jnp.dtype(patches.dtype).itemsize
    flops = 2 * nblk * (Rb * L * D + Rb * Rb * D + Gb * Rb * D + Gb * D * Dp)
    bytes_accessed = (
        patches.size * itm
        + (w1f.size + a_blk.size + pa_blk.size + w2p.size) * itm
        + (bias1_blk.size + b2p.size) * 4
        + B * G * Dp * 4)

    return pl.pallas_call(
        _fused_gcn_pool_kernel,
        out_shape=jax.ShapeDtypeStruct((B * G, Dp), jnp.float32),
        grid=(nblk,),
        in_specs=[
            pl.BlockSpec((Rb, L), lambda i: (i, 0)),    # patches: per block
            pl.BlockSpec((L, D), lambda i: (0, 0)),     # W1f: resident
            pl.BlockSpec((Rb, Rb), lambda i: (0, 0)),   # kron(I, A_hat)
            pl.BlockSpec((Rb, D), lambda i: (0, 0)),    # merged bias
            pl.BlockSpec((Gb, Rb), lambda i: (0, 0)),   # kron(I, pool@A_hat)
            pl.BlockSpec((D, Dp), lambda i: (0, 0)),    # padded W2
            pl.BlockSpec((1, Dp), lambda i: (0, 0)),    # padded b2
        ],
        out_specs=pl.BlockSpec((Gb, Dp), lambda i: (i, 0)),
        compiler_params=pltpu.CompilerParams(
            dimension_semantics=("parallel",)),
        cost_estimate=pl.CostEstimate(flops=flops, transcendentals=0,
                                      bytes_accessed=bytes_accessed),
    )(patches, w1f, a_blk, bias1_blk, pa_blk, w2p, b2p)


# ------------------- one-time host-side constant building ------------------ #

def build_norm_adj_np(edges_np, num_nodes):
    """A_hat = D^-1/2 (A + I) D^-1/2 with A[dst, src] = 1 (GCNConv w/ self-loops).

    Matches torch_geometric GCNConv for the symmetric edge list used here; for
    a directed edge list the in-/out-degree convention would need review.
    """
    a = np.zeros((num_nodes, num_nodes), np.float64)
    for s, d in edges_np:
        a[int(d), int(s)] += 1.0
    a += np.eye(num_nodes)
    d_inv_sqrt = 1.0 / np.sqrt(a.sum(axis=1))
    return (d_inv_sqrt[:, None] * a * d_inv_sqrt[None, :]).astype(np.float32)


def build_pool_matrix_np(node_split, num_nodes):
    """(G, H) matrix with 1/|group| at member columns -> mean over each group."""
    rows = []
    for g in node_split:
        g_np = np.asarray(g)
        r = np.zeros((num_nodes,), np.float32)
        r[g_np] = 1.0 / g_np.shape[0]
        rows.append(r)
    return np.stack(rows, axis=0)


def precompute_constants(edges, node_split, params, t_patch_len, num_nodes,
                         b_block, compute_dtype=jnp.float32, d_pad=128):
    """Built ONCE (host-side numpy), hoisted out of the forward pass."""
    H = num_nodes
    a_hat = build_norm_adj_np(np.asarray(edges), H)            # (H, H)
    pool = build_pool_matrix_np(node_split, H)                 # (G, H)
    w_t = np.asarray(params["w_t"], np.float32)                # (L, D)
    b_t = np.asarray(params["b_t"], np.float32)                # (1, D)
    w1 = np.asarray(params["w1"], np.float32)
    b1 = np.asarray(params["b1"], np.float32)
    w2 = np.asarray(params["w2"], np.float32)
    b2 = np.asarray(params["b2"], np.float32)
    L, D = w_t.shape
    G = pool.shape[0]

    # fold Conv1d into GCN layer-1 weight, and its bias through the aggregation
    w1f = w_t @ w1                                             # (L, D)
    bpre = b_t @ w1                                            # (1, D)
    bias1 = a_hat.sum(axis=1)[:, None] * bpre + b1             # (H, D)
    bias1_blk = np.tile(bias1, (b_block, 1))                   # (Rb, D)

    eye_b = np.eye(b_block, dtype=np.float32)
    a_blk = np.kron(eye_b, a_hat)                              # (Rb, Rb)
    pa_blk = np.kron(eye_b, pool @ a_hat)                      # (Gb, Rb)

    # pad W2 / b2 to 128 lanes so the output slab is lane-dense
    Dp = d_pad
    w2p = np.zeros((D, Dp), np.float32)
    w2p[:, :D] = w2
    b2p = np.zeros((1, Dp), np.float32)
    b2p[0, :D] = b2[0]

    return dict(
        w1f=jnp.asarray(w1f, compute_dtype),
        a_blk=jnp.asarray(a_blk, compute_dtype),
        bias1_blk=jnp.asarray(bias1_blk, jnp.float32),
        pa_blk=jnp.asarray(pa_blk, compute_dtype),
        w2p=jnp.asarray(w2p, compute_dtype),
        b2p=jnp.asarray(b2p, jnp.float32),
        # static metadata (python ints; used for shapes only)
        t_patch_len=int(L), d_model=int(D), num_groups=int(G),
        num_nodes=int(H), b_block=int(b_block), d_pad=int(Dp),
        compute_dtype=compute_dtype,
    )


# ------------------------------- forward ----------------------------------- #

def graph_embedding2_forward(x, consts):
    """x: (N, 1, T, H, 1) like the PyTorch module (dims 1 and 4 get squeezed)."""
    L = consts["t_patch_len"]
    D = consts["d_model"]
    G = consts["num_groups"]
    H = consts["num_nodes"]
    b_block = consts["b_block"]
    cdt = consts["compute_dtype"]

    N, _, T, Hx, _ = x.shape
    assert Hx == H
    P = T // L
    B = N * P
    assert B % b_block == 0, "batch-patches must tile the grid block"

    # layout plumbing stays in the wrapper: (B*H, L) patch matrix,
    # row = (n*P + p)*H + h, column = intra-patch time offset
    xs = x[:, 0, :, :, 0]                                       # (N, T, H)
    patches = (xs.reshape(N, P, L, H)
                 .transpose(0, 1, 3, 2)                         # (N, P, H, L)
                 .reshape(B * H, L)).astype(cdt)

    out_pad = fused_gcn_pool(
        patches, consts["w1f"], consts["a_blk"], consts["bias1_blk"],
        consts["pa_blk"], consts["w2p"], consts["b2p"],
        b_block=b_block, H=H, G=G)                              # (B*G, 128)

    out = out_pad[:, :D]                                        # drop lane pad
    # rows are (b, g) with b = n*P + p  ->  (N, P*G, D) like torch's cat+reshape
    return out.reshape(N, P, G, D).reshape(N, P * G, D)


# ------------------------------ reference ---------------------------------- #

def reference_forward(x, edges, node_split, params, t_patch_len):
    """Pure-jnp reference of the same math at HIGHEST precision."""
    hi = jax.lax.Precision.HIGHEST
    N, _, T, H, _ = x.shape
    L = t_patch_len
    D = params["w_t"].shape[1]
    P = T // L
    xs = jnp.transpose(x[:, 0, :, :, 0], (0, 2, 1))             # (N, H, T)
    patches = xs.reshape(N * H * P, L)
    emb = jnp.dot(patches, params["w_t"], precision=hi) + params["b_t"]
    emb = emb.reshape(N, H, P, D).transpose(0, 2, 1, 3).reshape(N * P, H, D)

    a_hat = jnp.asarray(build_norm_adj_np(np.asarray(edges), H))
    pool = jnp.asarray(build_pool_matrix_np(node_split, H))
    G = pool.shape[0]

    h = jnp.einsum("ij,bjd->bid", a_hat,
                   jnp.dot(emb, params["w1"], precision=hi),
                   precision=hi) + params["b1"]
    h = jnp.maximum(h, 0.0)
    h = jnp.einsum("ij,bjd->bid", a_hat,
                   jnp.dot(h, params["w2"], precision=hi),
                   precision=hi) + params["b2"]
    out = jnp.einsum("gj,bjd->bgd", pool, h, precision=hi)
    return out.reshape(N, P, G, D).reshape(N, P * G, D)


# --------------------------------- main ------------------------------------ #

if __name__ == "__main__":
    N, H = 2, 8                 # batch, graph nodes
    d_model = 32
    t_patch_len = 4
    his_len, pred_len = 16, 16
    T = his_len + pred_len      # 32
    P = T // t_patch_len        # 8 temporal patches
    B = N * P                   # 16 batch-patches

    key = jax.random.PRNGKey(0)
    keys = jax.random.split(key, 6)

    x = jax.random.normal(keys[0], (N, 1, T, H, 1), jnp.float32)

    # undirected ring graph over H nodes, (E, 2) = (src, dst) pairs
    src = jnp.arange(H, dtype=jnp.int32)
    dst = (src + 1) % H
    edges = jnp.concatenate(
        [jnp.stack([src, dst], 1), jnp.stack([dst, src], 1)], axis=0)

    # two node groups
    node_split = [jnp.arange(0, H // 2, dtype=jnp.int32),
                  jnp.arange(H // 2, H, dtype=jnp.int32)]

    # deterministic synthetic parameters (shapes from the module __init__)
    params = {
        # Conv1d(1, d_model, kernel=stride=t_patch_len) -> (L, D) matmul weight
        "w_t": 0.1 * jax.random.normal(keys[1], (t_patch_len, d_model), jnp.float32),
        "b_t": 0.01 * jax.random.normal(keys[2], (1, d_model), jnp.float32),
        # GCNConv(d_model, d_model) x 2
        "w1": 0.1 * jax.random.normal(keys[3], (d_model, d_model), jnp.float32),
        "b1": jnp.zeros((1, d_model), jnp.float32),
        "w2": 0.1 * jax.random.normal(keys[4], (d_model, d_model), jnp.float32),
        "b2": 0.01 * jax.random.normal(keys[5], (1, d_model), jnp.float32),
    }

    # batch-patch block size: fill the 128 MXU/sublane rows per grid step;
    # larger B gives grid>1 'parallel' steps (sharded across v7x TensorCores)
    b_block = min(B, max(1, 128 // H))

    # constants built exactly once, host-side, outside the forward / jit
    consts = precompute_constants(edges, node_split, params, t_patch_len, H,
                                  b_block, compute_dtype=jnp.float32)

    fwd = jax.jit(lambda xx: graph_embedding2_forward(xx, consts))
    out = jax.block_until_ready(fwd(x))
    assert out.shape == (N, P * len(node_split), d_model), out.shape

    ref = reference_forward(x, edges, node_split, params, t_patch_len)
    assert jnp.allclose(out, ref, atol=2e-4, rtol=2e-4), float(
        jnp.max(jnp.abs(out - ref)))

    print("KERNEL_OK")
</pallas_src>

<mosaic_0001>
module attributes {stable_mosaic.version = 11 : i64} {
  func.func @_fused_gcn_pool_kernel(%arg0: i32, %arg1: memref<128x4xf32, #tpu.memory_space<vmem>>, %arg2: memref<4x32xf32, #tpu.memory_space<vmem>>, %arg3: memref<128x128xf32, #tpu.memory_space<vmem>>, %arg4: memref<128x32xf32, #tpu.memory_space<vmem>>, %arg5: memref<32x128xf32, #tpu.memory_space<vmem>>, %arg6: memref<32x128xf32, #tpu.memory_space<vmem>>, %arg7: memref<1x128xf32, #tpu.memory_space<vmem>>, %arg8: memref<32x128xf32, #tpu.memory_space<vmem>>) attributes {dimension_semantics = [#tpu.dimension_semantics<parallel>], iteration_bounds = array<i64: 1>, scalar_prefetch = 0 : i64, scratch_operands = 0 : i64, tpu.core_type = #tpu.core_type<tc>, window_params = [{transform_indices = @transform_0, window_bounds = array<i64: 128, 4>}, {pipeline_mode = #tpu.pipeline_mode<synchronous>, transform_indices = @transform_1, window_bounds = array<i64: 4, 32>}, {pipeline_mode = #tpu.pipeline_mode<synchronous>, transform_indices = @transform_2, window_bounds = array<i64: 128, 128>}, {pipeline_mode = #tpu.pipeline_mode<synchronous>, transform_indices = @transform_3, window_bounds = array<i64: 128, 32>}, {pipeline_mode = #tpu.pipeline_mode<synchronous>, transform_indices = @transform_4, window_bounds = array<i64: 32, 128>}, {pipeline_mode = #tpu.pipeline_mode<synchronous>, transform_indices = @transform_5, window_bounds = array<i64: 32, 128>}, {pipeline_mode = #tpu.pipeline_mode<synchronous>, transform_indices = @transform_6, window_bounds = array<i64: 1, 128>}, {transform_indices = @transform_7, window_bounds = array<i64: 32, 128>}]} {
    %c0 = arith.constant 0 : index
    %c0_0 = arith.constant 0 : index
    %0 = vector.load %arg1[%c0, %c0_0] : memref<128x4xf32, #tpu.memory_space<vmem>>, vector<128x4xf32>
    %c0_1 = arith.constant 0 : index
    %c0_2 = arith.constant 0 : index
    %1 = vector.load %arg2[%c0_1, %c0_2] : memref<4x32xf32, #tpu.memory_space<vmem>>, vector<4x32xf32>
    %cst = arith.constant dense<0.000000e+00> : vector<128x32xf32>
    %2 = tpu.matmul %0, %1, %cst {dimension_numbers = #tpu.dot_dimension_numbers<[1], [0], [0], [1], [0, 0, 1, 1], [], []>} : vector<128x4xf32>, vector<4x32xf32>, vector<128x32xf32> -> vector<128x32xf32>
    %c0_3 = arith.constant 0 : index
    %c0_4 = arith.constant 0 : index
    %3 = vector.load %arg3[%c0_3, %c0_4] : memref<128x128xf32, #tpu.memory_space<vmem>>, vector<128x128xf32>
    %cst_5 = arith.constant dense<0.000000e+00> : vector<128x32xf32>
    %4 = tpu.matmul %3, %2, %cst_5 {dimension_numbers = #tpu.dot_dimension_numbers<[1], [0], [0], [1], [0, 0, 1, 1], [], []>} : vector<128x128xf32>, vector<128x32xf32>, vector<128x32xf32> -> vector<128x32xf32>
    %c0_6 = arith.constant 0 : index
    %c0_7 = arith.constant 0 : index
    %5 = vector.load %arg4[%c0_6, %c0_7] : memref<128x32xf32, #tpu.memory_space<vmem>>, vector<128x32xf32>
    %6 = arith.addf %4, %5 : vector<128x32xf32>
    %cst_8 = arith.constant 0.000000e+00 : f32
    %7 = vector.broadcast %cst_8 : f32 to vector<128x32xf32>
    %8 = arith.maximumf %6, %7 : vector<128x32xf32>
    %c0_9 = arith.constant 0 : index
    %c0_10 = arith.constant 0 : index
    %9 = vector.load %arg5[%c0_9, %c0_10] : memref<32x128xf32, #tpu.memory_space<vmem>>, vector<32x128xf32>
    %cst_11 = arith.constant dense<0.000000e+00> : vector<32x32xf32>
    %10 = tpu.matmul %9, %8, %cst_11 {dimension_numbers = #tpu.dot_dimension_numbers<[1], [0], [0], [1], [0, 0, 1, 1], [], []>} : vector<32x128xf32>, vector<128x32xf32>, vector<32x32xf32> -> vector<32x32xf32>
    %c0_12 = arith.constant 0 : index
    %c0_13 = arith.constant 0 : index
    %11 = vector.load %arg6[%c0_12, %c0_13] : memref<32x128xf32, #tpu.memory_space<vmem>>, vector<32x128xf32>
    %cst_14 = arith.constant dense<0.000000e+00> : vector<32x128xf32>
    %12 = tpu.matmul %10, %11, %cst_14 {dimension_numbers = #tpu.dot_dimension_numbers<[1], [0], [0], [1], [0, 0, 1, 1], [], []>} : vector<32x32xf32>, vector<32x128xf32>, vector<32x128xf32> -> vector<32x128xf32>
    %c0_15 = arith.constant 0 : index
    %c0_16 = arith.constant 0 : index
    %13 = vector.load %arg7[%c0_15, %c0_16] : memref<1x128xf32, #tpu.memory_space<vmem>>, vector<1x128xf32>
    %14 = vector.broadcast %13 : vector<1x128xf32> to vector<32x128xf32>
    %15 = arith.addf %12, %14 : vector<32x128xf32>
    %c0_17 = arith.constant 0 : index
    %c0_18 = arith.constant 0 : index
    %16 = vector.load %arg8[%c0_17, %c0_18] : memref<32x128xf32, #tpu.memory_space<vmem>>, vector<32x128xf32>
    tpu.vector_store %arg8[%c0_17, %c0_18], %15 {strides = array<i32>} : memref<32x128xf32, #tpu.memory_space<vmem>>, vector<32x128xf32>,
    return
  }
  func.func @transform_0(%arg0: i32) -> (i32, i32) {
    %c0_i32 = arith.constant 0 : i32
    %c0_i32_0 = arith.constant 0 : i32
    return %arg0, %c0_i32 : i32, i32
  }
  func.func @transform_1(%arg0: i32) -> (i32, i32) {
    %c0_i32 = arith.constant 0 : i32
    %c0_i32_0 = arith.constant 0 : i32
    %c0_i32_1 = arith.constant 0 : i32
    return %c0_i32, %c0_i32_0 : i32, i32
  }
  func.func @transform_2(%arg0: i32) -> (i32, i32) {
    %c0_i32 = arith.constant 0 : i32
    %c0_i32_0 = arith.constant 0 : i32
    %c0_i32_1 = arith.constant 0 : i32
    return %c0_i32, %c0_i32_0 : i32, i32
  }
  func.func @transform_3(%arg0: i32) -> (i32, i32) {
    %c0_i32 = arith.constant 0 : i32
    %c0_i32_0 = arith.constant 0 : i32
    %c0_i32_1 = arith.constant 0 : i32
    return %c0_i32, %c0_i32_0 : i32, i32
  }
  func.func @transform_4(%arg0: i32) -> (i32, i32) {
    %c0_i32 = arith.constant 0 : i32
    %c0_i32_0 = arith.constant 0 : i32
    %c0_i32_1 = arith.constant 0 : i32
    return %c0_i32, %c0_i32_0 : i32, i32
  }
  func.func @transform_5(%arg0: i32) -> (i32, i32) {
    %c0_i32 = arith.constant 0 : i32
    %c0_i32_0 = arith.constant 0 : i32
    %c0_i32_1 = arith.constant 0 : i32
    return %c0_i32, %c0_i32_0 : i32, i32
  }
  func.func @transform_6(%arg0: i32) -> (i32, i32) {
    %c0_i32 = arith.constant 0 : i32
    %c0_i32_0 = arith.constant 0 : i32
    %c0_i32_1 = arith.constant 0 : i32
    return %c0_i32, %c0_i32_0 : i32, i32
  }
  func.func @transform_7(%arg0: i32) -> (i32, i32) {
    %c0_i32 = arith.constant 0 : i32
    %c0_i32_0 = arith.constant 0 : i32
    return %arg0, %c0_i32 : i32, i32
  }
}

</mosaic_0001>

<bundles_post_ra>
// kernel: _lambda_.1
= control target key start
LH: loop header
LB: loop body
LE: loop exit
PB: predicated region body
PF: predicated region fallthrough
CT: control target
= control target key end

     0   :  { %12 = vsyncpa [#allocation3], 0  ;;  %s1332_s0 = inlined_call_operand.vmem [shape: f32[128,4], index: 0, kind: input, shape index: {}]   ;;  %s1333_s1 = inlined_call_operand.hbm [shape: f32[4,32], index: 1, kind: input, shape index: {}]   ;;  %s1334_s2 = inlined_call_operand.vmem [shape: f32[128,128], index: 2, kind: input, shape index: {}]   ;;  %s1335_s3 = inlined_call_operand.vmem [shape: f32[128,32], index: 3, kind: input, shape index: {}]   ;;  %s1336_s4 = inlined_call_operand.hbm [shape: f32[32,128], index: 4, kind: input, shape index: {}]   ;;  %s1337_s5 = inlined_call_operand.vmem [shape: f32[32,128], index: 5, kind: input, shape index: {}]   ;;  %s1338_s6 = inlined_call_operand.vmem [shape: f32[1,128], index: 6, kind: input, shape index: {}]   ;;  %s1339_s7 = inlined_call_operand.hbm [shape: f32[32,128], index: 7, kind: output, shape index: {}]  }
   0x1   :  { %13 = vsyncpa [#allocation6], 0 }
   0x2   :  { %14 = vsyncpa [#allocation4], 0  ;;  %s1063_s24 = smov [#allocation2]   ;;  %s1064_s26 = smov [#allocation5]  }
   0x3   :  { %s23_s25 = sshll.u32 %s1063_s24, 4  ;;  %s36_s27 = sshll.u32 %s1064_s26, 4  ;;  %s24_s25 = int_to_ptr.vmem [resolvable:$true] %s23_s25  ;;  %s1108_s27 = int_to_ptr.vmem [resolvable:$true] %s36_s27 }
   0x4   :  { %s991_s30 = scalar_lea.hbm %s1333_s1, 64 }
   0x5   :  { %p992_p0 = scmp.ne.s32.totalorder %s1333_s1, %s991_s30  ;;  %p995_p1 = scmp.lt.u32.totalorder %s991_s30, %s1333_s1 }
   0x7   :  { %p997_p2 = pnand %p995_p1, %p992_p0 }
   0x9   :  { %1000 = shalt.err (!%p997_p2)
}
   0xa   :  { %s1001_s12 = scalar_lea.vmem %s24_s25, 64  ;;  %p1006_p4 = scmp.lt.s32.totalorder %s24_s25, %s24_s25 }
   0xb   :  { %p1002_p3 = scmp.ne.s32.totalorder %s24_s25, %s1001_s12  ;;  %p1007_p5 = scmp.lt.s32.totalorder %s1001_s12, %s1001_s12 }
   0xd   :  { %p1008_p6 = por %p1007_p5, %p1006_p4 }
   0xf   :  { %p1009_p7 = pnand %p1008_p6, %p1002_p3 }
  0x11   :  { %1012 = shalt.err (!%p1009_p7)
}
  0x12   :  { %26 = dma.hbm_to_vmem [thread:$0]  %s1333_s1, 64, %s24_s25, [#allocation3]  }
  0x13   :  { %s1013_s17 = scalar_lea.hbm %s1336_s4, 512 }
  0x14   :  { %p1014_p8 = scmp.ne.s32.totalorder %s1336_s4, %s1013_s17  ;;  %p1017_p9 = scmp.lt.u32.totalorder %s1013_s17, %s1336_s4 }
  0x16   :  { %p1019_p10 = pnand %p1017_p9, %p1014_p8 }
  0x18   :  { %1022 = shalt.err (!%p1019_p10)
}
  0x19   :  { %s1023_s22 = scalar_lea.vmem %s1108_s27, 512  ;;  %p1028_p12 = scmp.lt.s32.totalorder %s1108_s27, %s1108_s27 }
  0x1a   :  { %p1024_p11 = scmp.ne.s32.totalorder %s1108_s27, %s1023_s22  ;;  %p1029_p13 = scmp.lt.s32.totalorder %s1023_s22, %s1023_s22 }
  0x1c   :  { %p1030_p0 = por %p1029_p13, %p1028_p12 }
  0x1e   :  { %p1031_p1 = pnand %p1030_p0, %p1024_p11 }
  0x20   :  { %1034 = shalt.err (!%p1031_p1)
}
  0x21   :  { %s1065_s1 = smov 128   ;;  %s1066_s23 = smov 8  }
  0x22   :  { %42 = dma.hbm_to_vmem [thread:$0]  %s1336_s4, 512, %s1108_s27, [#allocation6], %s1065_s1, %s1065_s1, %s1066_s23  }
  0x23   :  { %1057 = dma.done.wait [#allocation3], 64  }
  0x24   :  { %1058 = vsyncadd [#allocation3], 4294967232 }
  0x25   :  { %1059 = dma.done.wait [#allocation6], 512  }
  0x26   :  { %1060 = vsyncadd [#allocation6], 4294966784  ;;  %vm119_vm0 = vcmask 1043456   ;;  %vm70_vm1 = vcmask 31744   ;;  %v69_v0 = vld [vmem:[#allocation2] sm:$0xf] }
  0x27   :  { %v53_v1 = vld [vmem:[%s1332_s0] sm:$0xff]  ;;  %v54_v2 = vld [vmem:[%s1332_s0 + $0x8] sm:$0xff]  ;;  %780 = vmatprep.subr.msk.mxu0 %vm119_vm0, %v69_v0  ;;  %v55_v3 = vld [vmem:[%s1332_s0 + $0x10] sm:$0xff]  ;;  %vm561_vm2 = vcmask 261120   ;;  %s1067_s9 = smov [#allocation7]  }
  0x28   :  { %782 = vmatprep.mubr.msk.f32.mxu0 %vm70_vm1, %v53_v1  ;;  %781 = vmatpush3.msk.msra.mxu0 %vm119_vm0, %v69_v0  ;;  %v56_v4 = vld [vmem:[%s1332_s0 + $0x18] sm:$0xff]  ;;  %v57_v5 = vld [vmem:[%s1332_s0 + $0x20] sm:$0xff]  ;;  %v58_v6 = vld [vmem:[%s1332_s0 + $0x28] sm:$0xff]  ;;  %s668_s10 = sshll.u32 %s1067_s9, 4  ;;  %s669_s10 = int_to_ptr.vmem [resolvable:$true] %s668_s10 }
  0x29   :  { %783 = vmatmul.mubr.msk.f32.vlgmr.msra.gmra.mrb[0].mxu0 %vm70_vm1, %v54_v2  ;;  %v59_v7 = vld [vmem:[%s1332_s0 + $0x30] sm:$0xff]  ;;  %v60_v8 = vld [vmem:[%s1332_s0 + $0x38] sm:$0xff]  ;;  %v61_v9 = vld [vmem:[%s1332_s0 + $0x40] sm:$0xff]  ;;  %s1035_s11 = scalar_lea.vmem %s669_s10, 512  ;;  %p1040_p3 = scmp.lt.s32.totalorder %s669_s10, %s669_s10 }
  0x2a   :  { %785 = vmatprep.mubr.msk.f32.mxu0 %vm70_vm1, %v55_v3  ;;  %v62_v10 = vld [vmem:[%s1332_s0 + $0x48] sm:$0xff]  ;;  %v63_v11 = vld [vmem:[%s1332_s0 + $0x50] sm:$0xff]  ;;  %v64_v12 = vld [vmem:[%s1332_s0 + $0x58] sm:$0xff]  ;;  %p1036_p2 = scmp.ne.s32.totalorder %s669_s10, %s1035_s11  ;;  %p1041_p4 = scmp.lt.s32.totalorder %s1035_s11, %s1035_s11 }
  0x2b   :  { %v65_v13 = vld [vmem:[%s1332_s0 + $0x60] sm:$0xff]  ;;  %v66_v14 = vld [vmem:[%s1332_s0 + $0x68] sm:$0xff]  ;;  %v67_v15 = vld [vmem:[%s1332_s0 + $0x70] sm:$0xff] }
  0x2c   :  { %v68_v16 = vld [vmem:[%s1332_s0 + $0x78] sm:$0xff]  ;;  %v268_v17 = vld [vmem:[%s1334_s2] sm:$0xff]  ;;  %v269_v42 = vld [vmem:[%s1334_s2 + $0x8] sm:$0xff]  ;;  %p1042_p5 = por %p1041_p4, %p1040_p3 }
  0x2d   :  { %786 = vmatmul.mubr.msk.f32.gmra.mrb[2].mxu0 %vm70_vm1, %v56_v4  ;;  %838 = vmatprep.mubr.f32.mxu1 %v268_v17  ;;  %v270_v43 = vld [vmem:[%s1334_s2 + $0x10] sm:$0xff]  ;;  %v271_v44 = vld [vmem:[%s1334_s2 + $0x18] sm:$0xff]  ;;  %v272_v45 = vld [vmem:[%s1334_s2 + $0x20] sm:$0xff] }
  0x2e   :  { %788 = vmatprep.mubr.msk.f32.mxu0 %vm70_vm1, %v57_v5  ;;  %v273_v46 = vld [vmem:[%s1334_s2 + $0x28] sm:$0xff]  ;;  %v274_v47 = vld [vmem:[%s1334_s2 + $0x30] sm:$0xff]  ;;  %v275_v48 = vld [vmem:[%s1334_s2 + $0x38] sm:$0xff]  ;;  %p1043_p6 = pnand %p1042_p5, %p1036_p2 }
  0x2f   :  { %v276_v49 = vld [vmem:[%s1334_s2 + $0x40] sm:$0xff]  ;;  %v277_v50 = vld [vmem:[%s1334_s2 + $0x48] sm:$0xff]  ;;  %v278_v51 = vld [vmem:[%s1334_s2 + $0x50] sm:$0xff] }
  0x30   :  { %v279_v52 = vld [vmem:[%s1334_s2 + $0x58] sm:$0xff]  ;;  %v280_v53 = vld [vmem:[%s1334_s2 + $0x60] sm:$0xff]  ;;  %v281_v54 = vld [vmem:[%s1334_s2 + $0x68] sm:$0xff] }
  0x31   :  { %789 = vmatmul.mubr.msk.f32.gmra.mrb[4].mxu0 %vm70_vm1, %v58_v6  ;;  %v282_v55 = vld [vmem:[%s1334_s2 + $0x70] sm:$0xff]  ;;  %v283_v56 = vld [vmem:[%s1334_s2 + $0x78] sm:$0xff]  ;;  %v461_v57 = vld [vmem:[#allocation5] sm:$0xff] }
  0x32   :  { %791 = vmatprep.mubr.msk.f32.mxu0 %vm70_vm1, %v59_v7  ;;  %v285_v58 = vld [vmem:[%s1335_s3 + $0x8] sm:$0xff]  ;;  %v284_v59 = vld [vmem:[%s1335_s3] sm:$0xff]  ;;  %v287_v0 = vld [vmem:[%s1335_s3 + $0x18] sm:$0xff] }
  0x33   :  { %v286_v2 = vld [vmem:[%s1335_s3 + $0x10] sm:$0xff] }
  0x35   :  { %792 = vmatmul.mubr.msk.f32.gmra.mrb[6].mxu0 %vm70_vm1, %v60_v8 }
  0x36   :  { %794 = vmatprep.mubr.msk.f32.mxu0 %vm70_vm1, %v61_v9  ;;  %v289_v9 = vld [vmem:[%s1335_s3 + $0x28] sm:$0xff] }
  0x39   :  { %795 = vmatmul.mubr.msk.f32.gmra.mrb[8].mxu0 %vm70_vm1, %v62_v10 }
  0x3a   :  { %797 = vmatprep.mubr.msk.f32.mxu0 %vm70_vm1, %v63_v11  ;;  %v288_v11 = vld [vmem:[%s1335_s3 + $0x20] sm:$0xff] }
  0x3d   :  { %798 = vmatmul.mubr.msk.f32.gmra.mrb[10].mxu0 %vm70_vm1, %v64_v12 }
  0x3e   :  { %800 = vmatprep.mubr.msk.f32.mxu0 %vm70_vm1, %v65_v13 }
  0x41   :  { %801 = vmatmul.mubr.msk.f32.gmra.mrb[12].mxu0 %vm70_vm1, %v66_v14 }
  0x42   :  { %803 = vmatprep.mubr.msk.f32.mxu0 %vm70_vm1, %v67_v15 }
  0x45   :  { %804 = vmatmul.mubr.msk.f32.gmra.mrb[14].mxu0 %vm70_vm1, %v68_v16 }
  0x46   :  { %894 = vmatprep.mubr.f32.mxu0 %v461_v57 }
  0xfc   :  { %v784_v18 = vpop.f32.mrb[0].mxu0 }
  0xfd   :  { %v189_v19 = vpop.f32.mrb[1].mxu0 }
  0xfe   :  { %v914_v20 = vpack.c.bf16 %v784_v18, %v189_v19  ;;  %v291_v18 = vld [vmem:[%s1335_s3 + $0x38] sm:$0xff] }
 0x100   :  { %v787_v21 = vpop.f32.mrb[2].mxu0  ;;  %915 = vmatprep.subr.bf16.mxu1 %v914_v20 }
 0x101   :  { %v199_v22 = vpop.f32.mrb[3].mxu0  ;;  %917 = vmatpush3.bf16.msra.mxu1 %v914_v20  ;;  %v290_v20 = vld [vmem:[%s1335_s3 + $0x30] sm:$0xff] }
 0x102   :  { %v918_v23 = vpack.c.bf16 %v787_v21, %v199_v22 }
 0x104   :  { %v790_v24 = vpop.f32.mrb[4].mxu0  ;;  %919 = vmatprep.subr.bf16.mxu1 %v918_v23 }
 0x105   :  { %v209_v25 = vpop.f32.mrb[5].mxu0  ;;  %921 = vmatpush3.bf16.msra.mxu1 %v918_v23 }
 0x106   :  { %v922_v26 = vpack.c.bf16 %v790_v24, %v209_v25 }
 0x108   :  { %v793_v27 = vpop.f32.mrb[6].mxu0  ;;  %923 = vmatprep.subr.bf16.mxu1 %v922_v26 }
 0x109   :  { %v219_v28 = vpop.f32.mrb[7].mxu0  ;;  %925 = vmatpush3.bf16.msra.mxu1 %v922_v26 }
 0x10a   :  { %v926_v29 = vpack.c.bf16 %v793_v27, %v219_v28  ;;  %v293_v27 = vld [vmem:[%s1335_s3 + $0x48] sm:$0xff] }
 0x10c   :  { %v796_v30 = vpop.f32.mrb[8].mxu0  ;;  %927 = vmatprep.subr.bf16.mxu1 %v926_v29 }
 0x10d   :  { %v229_v31 = vpop.f32.mrb[9].mxu0  ;;  %929 = vmatpush3.bf16.msra.mxu1 %v926_v29  ;;  %v292_v29 = vld [vmem:[%s1335_s3 + $0x40] sm:$0xff] }
 0x10e   :  { %v930_v32 = vpack.c.bf16 %v796_v30, %v229_v31 }
 0x110   :  { %v799_v33 = vpop.f32.mrb[10].mxu0  ;;  %931 = vmatprep.subr.bf16.mxu1 %v930_v32 }
 0x111   :  { %v239_v34 = vpop.f32.mrb[11].mxu0  ;;  %933 = vmatpush3.bf16.msra.mxu1 %v930_v32 }
 0x112   :  { %v934_v35 = vpack.c.bf16 %v799_v33, %v239_v34 }
 0x114   :  { %v802_v36 = vpop.f32.mrb[12].mxu0  ;;  %935 = vmatprep.subr.bf16.mxu1 %v934_v35 }
 0x115   :  { %v249_v37 = vpop.f32.mrb[13].mxu0  ;;  %937 = vmatpush3.bf16.msra.mxu1 %v934_v35 }
 0x116   :  { %v938_v38 = vpack.c.bf16 %v802_v36, %v249_v37  ;;  %v295_v36 = vld [vmem:[%s1335_s3 + $0x58] sm:$0xff] }
 0x118   :  { %v805_v39 = vpop.f32.mrb[14].mxu0  ;;  %939 = vmatprep.subr.bf16.mxu1 %v938_v38 }
 0x119   :  { %v259_v40 = vpop.f32.mrb[15].mxu0  ;;  %941 = vmatpush3.bf16.msra.mxu1 %v938_v38  ;;  %v294_v38 = vld [vmem:[%s1335_s3 + $0x50] sm:$0xff] }
 0x11a   :  { %v942_v41 = vpack.c.bf16 %v805_v39, %v259_v40 }
 0x11c   :  { %943 = vmatprep.subr.bf16.mxu1 %v942_v41 }
 0x11d   :  { %945 = vmatpush3.bf16.msra.mxu1 %v942_v41 }
 0x120   :  { %839 = vmatmul.mubr.f32.vlgmr.msra.gmra.mrb[0].mxu1 %v269_v42 }
 0x121   :  { %841 = vmatprep.mubr.f32.mxu1 %v270_v43 }
 0x124   :  { %842 = vmatmul.mubr.f32.gmra.mrb[2].mxu1 %v271_v44 }
 0x125   :  { %844 = vmatprep.mubr.f32.mxu1 %v272_v45  ;;  %v297_v45 = vld [vmem:[%s1335_s3 + $0x68] sm:$0xff] }
 0x128   :  { %845 = vmatmul.mubr.f32.gmra.mrb[4].mxu1 %v273_v46 }
 0x129   :  { %847 = vmatprep.mubr.f32.mxu1 %v274_v47  ;;  %v296_v47 = vld [vmem:[%s1335_s3 + $0x60] sm:$0xff] }
 0x12c   :  { %848 = vmatmul.mubr.f32.gmra.mrb[6].mxu1 %v275_v48 }
 0x12d   :  { %850 = vmatprep.mubr.f32.mxu1 %v276_v49 }
 0x130   :  { %851 = vmatmul.mubr.f32.gmra.mrb[8].mxu1 %v277_v50 }
 0x131   :  { %853 = vmatprep.mubr.f32.mxu1 %v278_v51 }
 0x134   :  { %854 = vmatmul.mubr.f32.gmra.mrb[10].mxu1 %v279_v52 }
 0x135   :  { %856 = vmatprep.mubr.f32.mxu1 %v280_v53 }
 0x138   :  { %857 = vmatmul.mubr.f32.gmra.mrb[12].mxu1 %v281_v54  ;;  %v299_v54 = vld [vmem:[%s1335_s3 + $0x78] sm:$0xff] }
 0x139   :  { %859 = vmatprep.mubr.f32.mxu1 %v282_v55 }
 0x13c   :  { %860 = vmatmul.mubr.f32.gmra.mrb[14].mxu1 %v283_v56  ;;  %v298_v56 = vld [vmem:[%s1335_s3 + $0x70] sm:$0xff] }
 0x1f3   :  { %v840_v60 = vpop.f32.mrb[0].mxu1 }
 0x1f4   :  { %v372_v61 = vadd.f32 %v840_v60, %v285_v58  ;;  %v366_v62 = vpop.f32.mrb[1].mxu1 }
 0x1f5   :  { %v367_v63 = vadd.f32 %v366_v62, %v284_v59 }
 0x1f6   :  { %v446_v1 = vmax.f32 %v372_v61, 0.0 }
 0x1f7   :  { %v445_v3 = vmax.f32 %v367_v63, 0.0  ;;  %v843_v4 = vpop.f32.mrb[2].mxu1 }
 0x1f8   :  { %v382_v5 = vadd.f32 %v843_v4, %v287_v0  ;;  %v376_v6 = vpop.f32.mrb[3].mxu1  ;;  %v550_v0 = vld [vmem:[%s1337_s5] sm:$0xff] }
 0x1f9   :  { %v946_v7 = vpack.c.bf16 %v446_v1, %v445_v3  ;;  %v377_v8 = vadd.f32 %v376_v6, %v286_v2  ;;  %v551_v1 = vld [vmem:[%s1337_s5 + $0x8] sm:$0xff]  ;;  %v553_v6 = vld [vmem:[%s1337_s5 + $0x18] sm:$0xff] }
 0x1fa   :  { %v448_v10 = vmax.f32 %v382_v5, 0.0  ;;  %v978_v4 = vpack.c.bf16 %v551_v1, %v550_v0  ;;  %v552_v5 = vld [vmem:[%s1337_s5 + $0x10] sm:$0xff] }
 0x1fb   :  { %v447_v12 = vmax.f32 %v377_v8, 0.0  ;;  %v846_v13 = vpop.f32.mrb[4].mxu1  ;;  %947 = vmatprep.subr.bf16.mxu0 %v946_v7  ;;  %v463_v8 = vld [vmem:[#allocation5 + $0x10] sm:$0xff] }
 0x1fc   :  { %v392_v14 = vadd.f32 %v846_v13, %v289_v9  ;;  %v386_v15 = vpop.f32.mrb[5].mxu1  ;;  %949 = vmatpush3.bf16.msra.mxu0 %v946_v7  ;;  %v462_v7 = vld [vmem:[#allocation5 + $0x8] sm:$0xff]  ;;  %v982_v9 = vpack.c.bf16 %v553_v6, %v552_v5 }
 0x1fd   :  { %v950_v16 = vpack.c.bf16 %v448_v10, %v447_v12  ;;  %v387_v17 = vadd.f32 %v386_v15, %v288_v11  ;;  %v464_v10 = vld [vmem:[#allocation5 + $0x18] sm:$0xff] }
 0x1fe   :  { %v450_v19 = vmax.f32 %v392_v14, 0.0  ;;  %v698_v15 = vld [vmem:[%s1338_s6] ss:$0 sm:$0xff] }
 0x1ff   :  { %v449_v21 = vmax.f32 %v387_v17, 0.0  ;;  %v849_v22 = vpop.f32.mrb[6].mxu1  ;;  %951 = vmatprep.subr.bf16.mxu0 %v950_v16 }
 0x200   :  { %v402_v23 = vadd.f32 %v849_v22, %v291_v18  ;;  %v396_v24 = vpop.f32.mrb[7].mxu1  ;;  %953 = vmatpush3.bf16.msra.mxu0 %v950_v16 }
 0x201   :  { %v954_v25 = vpack.c.bf16 %v450_v19, %v449_v21  ;;  %v397_v26 = vadd.f32 %v396_v24, %v290_v20 }
 0x202   :  { %v452_v28 = vmax.f32 %v402_v23, 0.0 }
 0x203   :  { %v451_v30 = vmax.f32 %v397_v26, 0.0  ;;  %v852_v31 = vpop.f32.mrb[8].mxu1  ;;  %955 = vmatprep.subr.bf16.mxu0 %v954_v25 }
 0x204   :  { %v412_v32 = vadd.f32 %v852_v31, %v293_v27  ;;  %v406_v33 = vpop.f32.mrb[9].mxu1  ;;  %957 = vmatpush3.bf16.msra.mxu0 %v954_v25 }
 0x205   :  { %v958_v34 = vpack.c.bf16 %v452_v28, %v451_v30  ;;  %v407_v35 = vadd.f32 %v406_v33, %v292_v29 }
 0x206   :  { %v454_v37 = vmax.f32 %v412_v32, 0.0 }
 0x207   :  { %v453_v39 = vmax.f32 %v407_v35, 0.0  ;;  %v855_v40 = vpop.f32.mrb[10].mxu1  ;;  %959 = vmatprep.subr.bf16.mxu0 %v958_v34 }
 0x208   :  { %v422_v41 = vadd.f32 %v855_v40, %v295_v36  ;;  %v416_v42 = vpop.f32.mrb[11].mxu1  ;;  %961 = vmatpush3.bf16.msra.mxu0 %v958_v34 }
 0x209   :  { %v962_v43 = vpack.c.bf16 %v454_v37, %v453_v39  ;;  %v417_v44 = vadd.f32 %v416_v42, %v294_v38 }
 0x20a   :  { %v456_v46 = vmax.f32 %v422_v41, 0.0 }
 0x20b   :  { %v455_v48 = vmax.f32 %v417_v44, 0.0  ;;  %v858_v49 = vpop.f32.mrb[12].mxu1  ;;  %963 = vmatprep.subr.bf16.mxu0 %v962_v43 }
 0x20c   :  { %v432_v50 = vadd.f32 %v858_v49, %v297_v45  ;;  %v426_v51 = vpop.f32.mrb[13].mxu1  ;;  %965 = vmatpush3.bf16.msra.mxu0 %v962_v43 }
 0x20d   :  { %v966_v52 = vpack.c.bf16 %v456_v46, %v455_v48  ;;  %v427_v53 = vadd.f32 %v426_v51, %v296_v47 }
 0x20e   :  { %v458_v55 = vmax.f32 %v432_v50, 0.0 }
 0x20f   :  { %v457_v57 = vmax.f32 %v427_v53, 0.0  ;;  %v861_v58 = vpop.f32.mrb[14].mxu1  ;;  %967 = vmatprep.subr.bf16.mxu0 %v966_v52 }
 0x210   :  { %v442_v59 = vadd.f32 %v861_v58, %v299_v54  ;;  %v436_v60 = vpop.f32.mrb[15].mxu1  ;;  %969 = vmatpush3.bf16.msra.mxu0 %v966_v52 }
 0x211   :  { %v970_v61 = vpack.c.bf16 %v458_v55, %v457_v57  ;;  %v437_v62 = vadd.f32 %v436_v60, %v298_v56 }
 0x212   :  { %v460_v63 = vmax.f32 %v442_v59, 0.0 }
 0x213   :  { %v459_v2 = vmax.f32 %v437_v62, 0.0  ;;  %971 = vmatprep.subr.bf16.mxu0 %v970_v61 }
 0x214   :  { %973 = vmatpush3.bf16.msra.mxu0 %v970_v61 }
 0x215   :  { %v974_v3 = vpack.c.bf16 %v460_v63, %v459_v2 }
 0x217   :  { %975 = vmatprep.subr.bf16.mxu0 %v974_v3 }
 0x218   :  { %977 = vmatpush3.bf16.msra.mxu0 %v974_v3 }
 0x219   :  { %979 = vmatprep.subr.bf16.mxu0 %v978_v4 }
 0x21b   :  { %895 = vmatmul.mubr.f32.vlgmr.msra.gmra.mrb[16].mxu0 %v462_v7 }
 0x21c   :  { %897 = vmatprep.mubr.f32.mxu0 %v463_v8  ;;  %981 = vmatpush3.bf16.msra.mxu0 %v978_v4 }
 0x21d   :  { %983 = vmatprep.subr.bf16.mxu0 %v982_v9 }
 0x21f   :  { %898 = vmatmul.mubr.f32.gmra.mrb[18].mxu0 %v464_v10 }
 0x220   :  { %985 = vmatpush3.bf16.msra.mxu0 %v982_v9 }
 0x2ee   :  { %v896_v11 = vpop.f32.mrb[16].mxu0 }
 0x2ef   :  { %v531_v12 = vpop.f32.mrb[17].mxu0 }
 0x2f0   :  { %908 = vmatprep.mubr.msk.f32.mxu0 %vm561_vm2, %v531_v12 }
 0x2f1   :  { %909 = vmatmul.mubr.msk.f32.vlgmr.msra.gmra.mrb[20].mxu0 %vm561_vm2, %v896_v11 }
 0x2f2   :  { %v899_v13 = vpop.f32.mrb[18].mxu0 }
 0x2f3   :  { %v541_v14 = vpop.f32.mrb[19].mxu0 }
 0x2f4   :  { %911 = vmatprep.mubr.msk.f32.mxu0 %vm561_vm2, %v541_v14 }
 0x2f5   :  { %912 = vmatmul.mubr.msk.f32.gmra.mrb[22].mxu0 %vm561_vm2, %v899_v13 }
 0x3c4   :  { %v910_v16 = vpop.f32.mrb[20].mxu0 }
 0x3c5   :  { %v646_v17 = vadd.f32 %v910_v16, %v698_v15  ;;  %v640_v18 = vpop.f32.mrb[21].mxu0 }
 0x3c6   :  { %v641_v19 = vadd.f32 %v698_v15, %v640_v18 }
 0x3c7   :  { %660 = vst [vmem:[#allocation7 + $0x8] sm:$0xff] %v646_v17 }
 0x3c8   :  { %659 = vst [vmem:[#allocation7] sm:$0xff] %v641_v19  ;;  %v913_v20 = vpop.f32.mrb[22].mxu0 }
 0x3c9   :  { %v656_v21 = vadd.f32 %v913_v20, %v698_v15  ;;  %v650_v22 = vpop.f32.mrb[23].mxu0 }
 0x3ca   :  { %v651_v23 = vadd.f32 %v698_v15, %v650_v22 }
 0x3cb   :  { %662 = vst [vmem:[#allocation7 + $0x18] sm:$0xff] %v656_v21 }
 0x3cc   :  { %661 = vst [vmem:[#allocation7 + $0x10] sm:$0xff] %v651_v23 }
 0x3cd   :  { %1046 = shalt.err (!%p1043_p6)
}
 0x3ce   :  { %s1047_s0 = scalar_lea.hbm %s1339_s7, 512 }
 0x3cf   :  { %p1048_p7 = scmp.ne.s32.totalorder %s1339_s7, %s1047_s0  ;;  %p1051_p8 = scmp.lt.u32.totalorder %s1047_s0, %s1339_s7 }
 0x3d1   :  { %p1053_p9 = pnand %p1051_p8, %p1048_p7 }
 0x3d3   :  { %1056 = shalt.err (!%p1053_p9)
}
 0x3d4   :  { %674 = dma.vmem_to_hbm [thread:$0]  %s669_s10, 512, %s1339_s7, [#allocation4], %s1065_s1, %s1065_s1, %s1066_s23  }
 0x3d5   :  { %1061 = dma.done.wait [#allocation4], 512  }
 0x3d6   :  { %1062 = vsyncadd [#allocation4], 4294966784 }
 0x3d7   :  { %678 = vsyncpa [#allocation3], 1 }
 0x3d8   :  { %679 = vsyncpa [#allocation6], 1 }
 0x3d9   :  { %680 = vsyncpa [#allocation4], 1 }

</bundles_post_ra>
